<compile_context>
chip_gen: v5e
topology: v5e:2x2
jax: 0.10.0
libtpu: 0.0.40
codegen_flags: <defaults>
</compile_context>

<pallas_src>
import functools

import jax
import jax.numpy as jnp
from jax.experimental import pallas as pl
from jax.experimental.pallas import tpu as pltpu


def _round_up(a: int, b: int) -> int:
    return ((a + b - 1) // b) * b


def _vmem_capacity_bytes() -> int:
    try:
        return int(pltpu.get_tpu_info().vmem_capacity_bytes)
    except Exception:
        return 128 * 1024 * 1024  # conservative v5e/v6e default


def _gelu_exact(x):
    # PyTorch nn.GELU() default = exact erf formulation (computed in f32).
    return 0.5 * x * (1.0 + jax.lax.erf(x * jnp.float32(0.7071067811865476)))


def mlp_kernel(x_ref, w1_ref, w2_ref, o_ref, acc_ref):
    # Grid: (row_tiles, hidden_tiles); hidden is the reduction ("arbitrary") axis.
    #   x_ref  : (tm, dim_p)        VMEM, compute dtype
    #   w1_ref : (dim_p, th)        VMEM, compute dtype
    #   w2_ref : (th, dim_p)        VMEM, compute dtype
    #   o_ref  : (tm, dim_p)        VMEM, output dtype
    #   acc_ref: (tm, dim_p) f32    scratch accumulator, resident across hidden axis
    j = pl.program_id(1)

    # First matmul (MXU), f32 accumulation.
    h = jnp.dot(x_ref[...], w1_ref[...], preferred_element_type=jnp.float32)
    # GELU in f32 (safe on v5e where VPU/EUP have no bf16 path).
    g = _gelu_exact(h)
    # Dropout(p=0.0) is the identity -> no-op.
    # Second matmul: partial product for this hidden tile, accumulated in f32.
    partial = jnp.dot(
        g.astype(w2_ref.dtype), w2_ref[...], preferred_element_type=jnp.float32
    )

    @pl.when(j == 0)
    def _():
        acc_ref[...] = partial           # store (no zero-init / RMW on first tile)

    @pl.when(j > 0)
    def _():
        acc_ref[...] += partial

    @pl.when(j == pl.num_programs(1) - 1)
    def _():
        o_ref[...] = acc_ref[...].astype(o_ref.dtype)


def prepare_mlp_weights(w1, w2, compute_dtype=jnp.bfloat16):
    """Hoist the compute-dtype cast out of the per-call path (do it once)."""
    compute_dtype = jnp.dtype(compute_dtype)
    return w1.astype(compute_dtype), w2.astype(compute_dtype)


@functools.partial(
    jax.jit, static_argnames=("tile_rows", "tile_hidden", "compute_dtype")
)
def mlp_forward(x, w1, w2, *, tile_rows=None, tile_hidden=None,
                compute_dtype=jnp.bfloat16):
    """x: (batch, seq, dim). w1: (dim, hidden). w2: (hidden, dim).

    Weights are stored (in_features, out_features); this is the transpose of
    PyTorch's nn.Linear weight layout.  compute_dtype is the MXU input dtype
    (default bf16); accumulation / GELU are always f32, output keeps x.dtype.
    """
    orig_dtype = x.dtype
    batch, seq, dim = x.shape
    dim_w1, hidden = w1.shape
    assert dim_w1 == dim and w2.shape == (hidden, dim)

    compute_dtype = jnp.dtype(compute_dtype)
    itemsize = compute_dtype.itemsize
    rows = batch * seq

    # --- Hardware-aware caps / tile defaults ------------------------------
    vmem_capacity = _vmem_capacity_bytes()
    vmem_cap = vmem_capacity - max(8 * 1024 * 1024, vmem_capacity // 8)
    if tile_rows is None:
        # 128 MiB parts (v5e/v6e): big row tiles to get off the HBM roofline.
        # 64 MiB parts (v7x): smaller row tile, 2 TCs share the parallel axis.
        tile_rows = 768 if vmem_capacity >= 96 * 1024 * 1024 else 384
    if tile_hidden is None:
        tile_hidden = 512

    # --- Tile / padding selection ----------------------------------------
    # Lane-dense output: feature dim padded to a multiple of 128.
    dim_p = _round_up(dim, 128)
    # Row tile: multiple of 8 sublanes, no bigger than the (padded) row count.
    tm = _round_up(min(tile_rows, _round_up(rows, 8)), 8)
    # Hidden tile: multiple of 128, no bigger than the (padded) hidden dim.
    th = _round_up(min(tile_hidden, _round_up(hidden, 128)), 128)

    # Megacore clamp: ensure >= 2 row tiles so both v7x TensorCores get work.
    if rows > 8 and _round_up(rows, tm) // tm < 2:
        tm = _round_up(-(-rows // 2), 8)

    # VMEM footprint of one grid step, including double-buffered I/O tiles,
    # the f32 accumulator, and the (tm, th) h/g intermediates + bf16 cast of g.
    def _tile_bytes(tm_, th_):
        return (
            2 * tm_ * dim_p * itemsize                 # x tiles (double-buffered)
            + 2 * dim_p * th_ * itemsize               # w1 tiles
            + 2 * th_ * dim_p * itemsize               # w2 tiles
            + 2 * tm_ * dim_p * orig_dtype.itemsize    # out tiles
            + tm_ * dim_p * 4                          # f32 accumulator scratch
            + 2 * tm_ * th_ * 4                        # h, g f32 intermediates
            + tm_ * th_ * itemsize                     # compute-dtype cast of g
        )

    # Shrink tiles until the footprint fits the per-generation VMEM cap.
    while _tile_bytes(tm, th) > vmem_cap:
        if th > 256:
            th = max(256, _round_up(th // 2, 128))
        elif tm > 256:
            tm = max(256, _round_up(tm // 2, 8))
        elif th > 128:
            th = 128
        elif tm > 8:
            tm = max(8, _round_up(tm // 2, 8))
        else:
            break

    rows_p = _round_up(rows, tm)
    hidden_p = _round_up(hidden, th)

    # --- Zero-pad / cast operands (zeros are exact no-ops through Linear/GELU).
    # Pad/cast is skipped statically when operands are already aligned / typed
    # (use prepare_mlp_weights() to hoist the weight cast out of the hot path).
    x2d = x.reshape(rows, dim)
    if x2d.dtype != compute_dtype:
        x2d = x2d.astype(compute_dtype)
    if (rows_p, dim_p) != (rows, dim):
        x2d = jnp.pad(x2d, ((0, rows_p - rows), (0, dim_p - dim)))

    w1_p = w1 if w1.dtype == compute_dtype else w1.astype(compute_dtype)
    if (dim_p, hidden_p) != (dim, hidden):
        w1_p = jnp.pad(w1_p, ((0, dim_p - dim), (0, hidden_p - hidden)))
    w2_p = w2 if w2.dtype == compute_dtype else w2.astype(compute_dtype)
    if (hidden_p, dim_p) != (hidden, dim):
        w2_p = jnp.pad(w2_p, ((0, hidden_p - hidden), (0, dim_p - dim)))

    tile_bytes = _tile_bytes(tm, th)
    vmem_limit = int(min(vmem_cap, max(int(1.25 * tile_bytes), 32 * 1024 * 1024)))

    row_tiles = rows_p // tm
    cost = pl.CostEstimate(
        flops=4 * rows_p * dim_p * hidden_p,            # two matmuls
        transcendentals=rows_p * hidden_p,              # erf per hidden activation
        bytes_accessed=(
            rows_p * dim_p * itemsize                   # x streamed once
            + rows_p * dim_p * orig_dtype.itemsize      # output written once
            + row_tiles * 2 * dim_p * hidden_p * itemsize   # w1+w2 re-streamed per row tile
        ),
    )

    out2d = pl.pallas_call(
        mlp_kernel,
        out_shape=jax.ShapeDtypeStruct((rows_p, dim_p), orig_dtype),
        grid_spec=pltpu.PrefetchScalarGridSpec(
            num_scalar_prefetch=0,
            grid=(row_tiles, hidden_p // th),
            in_specs=[
                pl.BlockSpec((tm, dim_p), lambda i, j: (i, 0)),
                pl.BlockSpec((dim_p, th), lambda i, j: (0, j)),
                pl.BlockSpec((th, dim_p), lambda i, j: (j, 0)),
            ],
            out_specs=pl.BlockSpec((tm, dim_p), lambda i, j: (i, 0)),
            scratch_shapes=[pltpu.VMEM((tm, dim_p), jnp.float32)],
        ),
        compiler_params=pltpu.CompilerParams(
            dimension_semantics=("parallel", "arbitrary"),
            vmem_limit_bytes=vmem_limit,
        ),
        cost_estimate=cost,
    )(x2d, w1_p, w2_p)

    return out2d[:rows, :dim].reshape(batch, seq, dim)


def init_mlp_params(key, dim, hidden_dim, std=0.02):
    """trunc_normal_(std=0.02), truncated at +/- 2 std, matching PyTorch.
    Returns weights in (in_features, out_features) layout."""
    k1, k2 = jax.random.split(key)
    w1 = std * jax.random.truncated_normal(k1, -2.0, 2.0, (dim, hidden_dim), jnp.float32)
    w2 = std * jax.random.truncated_normal(k2, -2.0, 2.0, (hidden_dim, dim), jnp.float32)
    return w1, w2


def _reference(x, w1, w2):
    h = jnp.einsum("bsd,dh->bsh", x, w1)
    g = 0.5 * h * (1.0 + jax.lax.erf(h / jnp.sqrt(2.0)))
    return jnp.einsum("bsh,hd->bsd", g, w2)


if __name__ == "__main__":
    key = jax.random.PRNGKey(0)
    kx1, kp1, kx2, kp2 = jax.random.split(key, 4)

    # --- Small shape (matches the toy module config), f32 exact-parity path
    batch, seq, dim, hidden_dim = 2, 8, 32, 64
    x = jax.random.normal(kx1, (batch, seq, dim), dtype=jnp.float32)
    w1, w2 = init_mlp_params(kp1, dim, hidden_dim)

    out = jax.block_until_ready(mlp_forward(x, w1, w2, compute_dtype=jnp.float32))
    ref = _reference(x, w1, w2)
    assert out.shape == (batch, seq, dim)
    assert jnp.allclose(out, ref, atol=1e-5, rtol=1e-5)

    # --- Medium shape exercising multi-tile grid + hidden accumulation ----
    b2, s2, d2, h2 = 2, 64, 256, 512
    x2 = jax.random.normal(kx2, (b2, s2, d2), dtype=jnp.float32)
    w1b, w2b = init_mlp_params(kp2, d2, h2)
    ref2 = _reference(x2, w1b, w2b)

    # f32 exact-parity path, forced hidden tiling.
    out2 = jax.block_until_ready(
        mlp_forward(x2, w1b, w2b, tile_hidden=256, compute_dtype=jnp.float32)
    )
    assert out2.shape == (b2, s2, d2)
    assert jnp.allclose(out2, ref2, atol=1e-4, rtol=1e-4)

    # Default bf16 MXU-input path (f32 accumulation); weights pre-cast once.
    w1_bf, w2_bf = prepare_mlp_weights(w1b, w2b, jnp.bfloat16)
    out_bf16 = jax.block_until_ready(
        mlp_forward(x2, w1_bf, w2_bf, tile_hidden=256)
    )
    assert out_bf16.shape == (b2, s2, d2)
    assert out_bf16.dtype == x2.dtype
    assert jnp.allclose(out_bf16, ref2, atol=2e-2, rtol=1e-1)

    print("KERNEL_OK")
</pallas_src>

<mosaic_0001>
module attributes {stable_mosaic.version = 11 : i64} {
  func.func @mlp_kernel(%arg0: i32, %arg1: i32, %arg2: memref<8x128xf32, #tpu.memory_space<vmem>>, %arg3: memref<128x128xf32, #tpu.memory_space<vmem>>, %arg4: memref<128x128xf32, #tpu.memory_space<vmem>>, %arg5: memref<8x128xf32, #tpu.memory_space<vmem>>, %arg6: memref<8x128xf32, #tpu.memory_space<vmem>>) attributes {dimension_semantics = [#tpu.dimension_semantics<parallel>, #tpu.dimension_semantics<arbitrary>], iteration_bounds = array<i64: 2, 1>, scalar_prefetch = 0 : i64, scratch_operands = 1 : i64, tpu.core_type = #tpu.core_type<tc>, window_params = [{transform_indices = @transform_0, window_bounds = array<i64: 8, 128>}, {transform_indices = @transform_1, window_bounds = array<i64: 128, 128>}, {transform_indices = @transform_2, window_bounds = array<i64: 128, 128>}, {transform_indices = @transform_3, window_bounds = array<i64: 8, 128>}]} {
    %c0 = arith.constant 0 : index
    %c0_0 = arith.constant 0 : index
    %0 = vector.load %arg2[%c0, %c0_0] : memref<8x128xf32, #tpu.memory_space<vmem>>, vector<8x128xf32>
    %c0_1 = arith.constant 0 : index
    %c0_2 = arith.constant 0 : index
    %1 = vector.load %arg3[%c0_1, %c0_2] : memref<128x128xf32, #tpu.memory_space<vmem>>, vector<128x128xf32>
    %cst = arith.constant dense<0.000000e+00> : vector<8x128xf32>
    %2 = tpu.matmul %0, %1, %cst {dimension_numbers = #tpu.dot_dimension_numbers<[1], [0], [0], [1], [0, 0, 1, 1], [], []>} : vector<8x128xf32>, vector<128x128xf32>, vector<8x128xf32> -> vector<8x128xf32>
    %cst_3 = arith.constant 5.000000e-01 : f32
    %3 = vector.broadcast %cst_3 : f32 to vector<8x128xf32>
    %4 = arith.mulf %3, %2 : vector<8x128xf32>
    %cst_4 = arith.constant 0.707106769 : f32
    %5 = vector.broadcast %cst_4 : f32 to vector<8x128xf32>
    %6 = arith.mulf %2, %5 : vector<8x128xf32>
    %7 = math.erf %6 : vector<8x128xf32>
    %cst_5 = arith.constant 1.000000e+00 : f32
    %8 = vector.broadcast %cst_5 : f32 to vector<8x128xf32>
    %9 = arith.addf %8, %7 : vector<8x128xf32>
    %10 = arith.mulf %4, %9 : vector<8x128xf32>
    %c0_6 = arith.constant 0 : index
    %c0_7 = arith.constant 0 : index
    %11 = vector.load %arg4[%c0_6, %c0_7] : memref<128x128xf32, #tpu.memory_space<vmem>>, vector<128x128xf32>
    %cst_8 = arith.constant dense<0.000000e+00> : vector<8x128xf32>
    %12 = tpu.matmul %10, %11, %cst_8 {dimension_numbers = #tpu.dot_dimension_numbers<[1], [0], [0], [1], [0, 0, 1, 1], [], []>} : vector<8x128xf32>, vector<128x128xf32>, vector<8x128xf32> -> vector<8x128xf32>
    %c0_i32 = arith.constant 0 : i32
    %13 = arith.cmpi eq, %arg1, %c0_i32 : i32
    %14 = arith.extui %13 : i1 to i32
    %c0_i32_9 = arith.constant 0 : i32
    %15 = arith.cmpi ne, %14, %c0_i32_9 : i32
    scf.if %15 {
      %c0_14 = arith.constant 0 : index
      %c0_15 = arith.constant 0 : index
      %22 = vector.load %arg6[%c0_14, %c0_15] : memref<8x128xf32, #tpu.memory_space<vmem>>, vector<8x128xf32>
      tpu.vector_store %arg6[%c0_14, %c0_15], %12 {strides = array<i32>} : memref<8x128xf32, #tpu.memory_space<vmem>>, vector<8x128xf32>,
    } else {
    }
    %c0_i32_10 = arith.constant 0 : i32
    %16 = arith.cmpi sgt, %arg1, %c0_i32_10 : i32
    %17 = arith.extui %16 : i1 to i32
    %c0_i32_11 = arith.constant 0 : i32
    %18 = arith.cmpi ne, %17, %c0_i32_11 : i32
    scf.if %18 {
      %c0_14 = arith.constant 0 : index
      %c0_15 = arith.constant 0 : index
      %22 = vector.load %arg6[%c0_14, %c0_15] : memref<8x128xf32, #tpu.memory_space<vmem>>, vector<8x128xf32>
      %23 = arith.addf %22, %12 : vector<8x128xf32>
      %c0_16 = arith.constant 0 : index
      %c0_17 = arith.constant 0 : index
      %24 = vector.load %arg6[%c0_16, %c0_17] : memref<8x128xf32, #tpu.memory_space<vmem>>, vector<8x128xf32>
      tpu.vector_store %arg6[%c0_16, %c0_17], %23 {strides = array<i32>} : memref<8x128xf32, #tpu.memory_space<vmem>>, vector<8x128xf32>,
    } else {
    }
    %c0_i32_12 = arith.constant 0 : i32
    %19 = arith.cmpi eq, %arg1, %c0_i32_12 : i32
    %20 = arith.extui %19 : i1 to i32
    %c0_i32_13 = arith.constant 0 : i32
    %21 = arith.cmpi ne, %20, %c0_i32_13 : i32
    scf.if %21 {
      %c0_14 = arith.constant 0 : index
      %c0_15 = arith.constant 0 : index
      %22 = vector.load %arg6[%c0_14, %c0_15] : memref<8x128xf32, #tpu.memory_space<vmem>>, vector<8x128xf32>
      %c0_16 = arith.constant 0 : index
      %c0_17 = arith.constant 0 : index
      %23 = vector.load %arg5[%c0_16, %c0_17] : memref<8x128xf32, #tpu.memory_space<vmem>>, vector<8x128xf32>
      tpu.vector_store %arg5[%c0_16, %c0_17], %22 {strides = array<i32>} : memref<8x128xf32, #tpu.memory_space<vmem>>, vector<8x128xf32>,
    } else {
    }
    return
  }
  func.func @transform_0(%arg0: i32, %arg1: i32) -> (i32, i32) {
    %c0_i32 = arith.constant 0 : i32
    %c0_i32_0 = arith.constant 0 : i32
    return %arg0, %c0_i32 : i32, i32
  }
  func.func @transform_1(%arg0: i32, %arg1: i32) -> (i32, i32) {
    %c0_i32 = arith.constant 0 : i32
    %c0_i32_0 = arith.constant 0 : i32
    return %c0_i32, %arg1 : i32, i32
  }
  func.func @transform_2(%arg0: i32, %arg1: i32) -> (i32, i32) {
    %c0_i32 = arith.constant 0 : i32
    %c0_i32_0 = arith.constant 0 : i32
    return %arg1, %c0_i32 : i32, i32
  }
  func.func @transform_3(%arg0: i32, %arg1: i32) -> (i32, i32) {
    %c0_i32 = arith.constant 0 : i32
    %c0_i32_0 = arith.constant 0 : i32
    return %arg0, %c0_i32 : i32, i32
  }
}

</mosaic_0001>

<bundles_post_ra>
// kernel: mlp_forward.1
= control target key start
LH: loop header
LB: loop body
LE: loop exit
PB: predicated region body
PF: predicated region fallthrough
CT: control target
= control target key end

     0   :  { %s525_s12 = smov 0   ;;  %s527_s13 = smov 0   ;;  %s665_s0 = inlined_call_operand.vmem [shape: f32[16,128], index: 0, kind: input, shape index: {}]   ;;  %s666_s1 = inlined_call_operand.vmem [shape: f32[128,128], index: 1, kind: input, shape index: {}]   ;;  %s667_s2 = inlined_call_operand.vmem [shape: f32[128,128], index: 2, kind: input, shape index: {}]   ;;  %s668_s3 = inlined_call_operand.vmem [shape: f32[16,128], index: 3, kind: output, shape index: {}]  }
   0x1   :  { %s529_s14 = smov 0  }
   0x2 LB: > { %s25_s15 = sadd.s32 1, %s499_s13  ;;  %p449_p0 = scmp.ge.s32.totalorder %s503_s14, 1  ;;  %s503_s14 = sphi %s529_s14, %s13_s14   ;;  %s499_s13 = sphi %s527_s13, %s670_s13   ;;  %s495_s12 = sphi %s525_s12, %s669_s12  }
   0x3   : > { %p27_p1 = scmp.ge.s32.totalorder %s25_s15, 2  ;;  %p168_p2 = scmp.lt.s32.totalorder %s503_s14, 3 }
   0x5   : > { %s672_s15 = smov (%p27_p1, %s25_s15), 0  ;;  %p169_p3 = pnand %p449_p0, %p168_p2 }
   0x6   : > { %p199_p4 = scmp.lt.s32.totalorder (!%p169_p3), %s495_s12, 1 }
   0x7   : > { %172 = sbr.rel (%p169_p3) target bundleno = 348 (0x15c), region = 32 }
   0xc   : > { %v233_v0 = vld [vmem:[%s666_s1 + $0x78] sm:$0xff]  ;;  %v232_v1 = vld [vmem:[%s666_s1 + $0x70] sm:$0xff]  ;;  %v231_v2 = vld [vmem:[%s666_s1 + $0x68] sm:$0xff]  ;;  %s674_s12 = smov (!%p199_p4, %s495_s12), 1 }
   0xd   : > { %234 = vmatpush.msra.mxu0 %v233_v0  ;;  %v230_v3 = vld [vmem:[%s666_s1 + $0x60] sm:$0xff]  ;;  %v229_v4 = vld [vmem:[%s666_s1 + $0x58] sm:$0xff]  ;;  %v228_v5 = vld [vmem:[%s666_s1 + $0x50] sm:$0xff]  ;;  %s450_s19 = sshll.u32 %s674_s12, 3 }
   0xe   : > { %v227_v6 = vld [vmem:[%s666_s1 + $0x48] sm:$0xff]  ;;  %v226_v7 = vld [vmem:[%s666_s1 + $0x40] sm:$0xff]  ;;  %v225_v8 = vld [vmem:[%s666_s1 + $0x38] sm:$0xff]  ;;  %s202_s26 = scalar_lea.vmem %s665_s0, %s450_s19  ;;  %s216_s18 = scalar_lea.vmem %s668_s3, %s450_s19 }
   0xf   : > { %235 = vmatpush.msra.mxu0 %v232_v1  ;;  %v224_v9 = vld [vmem:[%s666_s1 + $0x30] sm:$0xff]  ;;  %v223_v10 = vld [vmem:[%s666_s1 + $0x28] sm:$0xff]  ;;  %v222_v11 = vld [vmem:[%s666_s1 + $0x20] sm:$0xff] }
  0x10   : > { %v221_v12 = vld [vmem:[%s666_s1 + $0x18] sm:$0xff]  ;;  %v220_v13 = vld [vmem:[%s666_s1 + $0x10] sm:$0xff]  ;;  %v219_v14 = vld [vmem:[%s666_s1 + $0x8] sm:$0xff] }
  0x11   : > { %236 = vmatpush.msra.mxu0 %v231_v2  ;;  %v218_v15 = vld [vmem:[%s666_s1] sm:$0xff]  ;;  %v313_v17 = vld [vmem:[%s667_s2 + $0x78] sm:$0xff]  ;;  %v312_v18 = vld [vmem:[%s667_s2 + $0x70] sm:$0xff] }
  0x12   : > { %v217_v16 = vld [vmem:[%s202_s26] sm:$0xff]  ;;  %314 = vmatpush.msra.mxu1 %v313_v17  ;;  %v311_v19 = vld [vmem:[%s667_s2 + $0x68] sm:$0xff]  ;;  %v309_v21 = vld [vmem:[%s667_s2 + $0x58] sm:$0xff] }
  0x13   : > { %237 = vmatpush.msra.mxu0 %v230_v3  ;;  %v310_v20 = vld [vmem:[%s667_s2 + $0x60] sm:$0xff]  ;;  %v308_v22 = vld [vmem:[%s667_s2 + $0x50] sm:$0xff]  ;;  %v307_v23 = vld [vmem:[%s667_s2 + $0x48] sm:$0xff] }
  0x14   : > { %315 = vmatpush.msra.mxu1 %v312_v18  ;;  %v306_v25 = vld [vmem:[%s667_s2 + $0x40] sm:$0xff]  ;;  %v305_v27 = vld [vmem:[%s667_s2 + $0x38] sm:$0xff]  ;;  %v304_v29 = vld [vmem:[%s667_s2 + $0x30] sm:$0xff] }
  0x15   : > { %238 = vmatpush.msra.mxu0 %v229_v4  ;;  %v303_v31 = vld [vmem:[%s667_s2 + $0x28] sm:$0xff]  ;;  %v302_v34 = vld [vmem:[%s667_s2 + $0x20] sm:$0xff]  ;;  %v301_v37 = vld [vmem:[%s667_s2 + $0x18] sm:$0xff] }
  0x16   : > { %316 = vmatpush.msra.mxu1 %v311_v19  ;;  %v300_v40 = vld [vmem:[%s667_s2 + $0x10] sm:$0xff]  ;;  %v299_v43 = vld [vmem:[%s667_s2 + $0x8] sm:$0xff]  ;;  %v298_v45 = vld [vmem:[%s667_s2] sm:$0xff] }
  0x17   : > { %239 = vmatpush.msra.mxu0 %v228_v5 }
  0x18   : > { %317 = vmatpush.msra.mxu1 %v310_v20 }
  0x19   : > { %240 = vmatpush.msra.mxu0 %v227_v6 }
  0x1a   : > { %318 = vmatpush.msra.mxu1 %v309_v21 }
  0x1b   : > { %241 = vmatpush.msra.mxu0 %v226_v7 }
  0x1c   : > { %319 = vmatpush.msra.mxu1 %v308_v22 }
  0x1d   : > { %242 = vmatpush.msra.mxu0 %v225_v8 }
  0x1e   : > { %320 = vmatpush.msra.mxu1 %v307_v23 }
  0x1f   : > { %243 = vmatpush.msra.mxu0 %v224_v9 }
  0x20   : > { %321 = vmatpush.msra.mxu1 %v306_v25 }
  0x21   : > { %244 = vmatpush.msra.mxu0 %v223_v10 }
  0x22   : > { %322 = vmatpush.msra.mxu1 %v305_v27 }
  0x23   : > { %245 = vmatpush.msra.mxu0 %v222_v11 }
  0x24   : > { %323 = vmatpush.msra.mxu1 %v304_v29 }
  0x25   : > { %246 = vmatpush.msra.mxu0 %v221_v12 }
  0x26   : > { %324 = vmatpush.msra.mxu1 %v303_v31 }
  0x27   : > { %247 = vmatpush.msra.mxu0 %v220_v13 }
  0x28   : > { %325 = vmatpush.msra.mxu1 %v302_v34 }
  0x29   : > { %248 = vmatpush.msra.mxu0 %v219_v14 }
  0x2a   : > { %326 = vmatpush.msra.mxu1 %v301_v37 }
  0x2b   : > { %249 = vmatpush.msra.mxu0 %v218_v15 }
  0x2c   : > { %250 = vmatmul.f32.vlgmr.msra.gmra.mxu0 %v217_v16  ;;  %327 = vmatpush.msra.mxu1 %v300_v40 }
  0x2e   : > { %328 = vmatpush.msra.mxu1 %v299_v43 }
  0x30   : > { %329 = vmatpush.msra.mxu1 %v298_v45 }
  0xa9   : > { %v251_v24 = vpop.f32.mrf.mxu0 }
  0xaa   : > { %v255_v26 = vmul.f32 0.70710677, %v251_v24  ;;  %v254_v6 = vmul.f32 0.5, %v251_v24 }
  0xac   : > { %v256_v28 = vmul.f32 %v255_v26, %v255_v26 }
  0xae   : > { %v257_v30 = vmin.f32 %v256_v28, 16.0 }
  0xb0   : > { %v258_v32 = vmul.f32 2.1237322e-06, %v257_v30  ;;  %v269_v33 = vmul.f32 3.8918573e-05, %v257_v30 }
  0xb2   : > { %v259_v35 = vadd.f32 0.00028619796, %v258_v32  ;;  %v270_v36 = vadd.f32 0.001143296, %v269_v33 }
  0xb4   : > { %v260_v38 = vmul.f32 %v259_v35, %v257_v30  ;;  %v271_v39 = vmul.f32 %v270_v36, %v257_v30 }
  0xb6   : > { %v272_v41 = vadd.f32 0.014752088, %v271_v39  ;;  %v261_v42 = vadd.f32 0.0036580483, %v260_v38 }
  0xb8   : > { %v273_v44 = vmul.f32 %v272_v41, %v257_v30  ;;  %v262_v47 = vmul.f32 %v261_v42, %v257_v30 }
  0xba   : > { %v274_v46 = vadd.f32 0.112945676, %v273_v44  ;;  %v263_v50 = vadd.f32 0.05243302, %v262_v47 }
  0xbc   : > { %v275_v48 = vmul.f32 %v274_v46, %v257_v30  ;;  %v264_v53 = vmul.f32 %v263_v50, %v257_v30 }
  0xbe   : > { %v276_v49 = vadd.f32 0.4994258, %v275_v48  ;;  %v265_v54 = vadd.f32 0.18741608, %v264_v53 }
  0xc0   : > { %v277_v51 = vmul.f32 %v276_v49, %v257_v30  ;;  %v266_v56 = vmul.f32 %v265_v54, %v257_v30 }
  0xc2   : > { %v278_v52 = vadd.f32 1.0, %v277_v51  ;;  %v267_v60 = vadd.f32 1.1283791, %v266_v56 }
  0xc4   : > { %479 = vrcp.f32 %v278_v52  ;;  %v290_v59 = vand.u32 2147483648, %v278_v52  ;;  %v288_v62 = vand.u32 2147483647, %v278_v52  ;;  %vm284_vm1 = vweird.f32 %v278_v52 }
  0xc5   : > { %v268_v1 = vmul.f32 %v267_v60, %v255_v26 }
  0xc6   : > { %v291_v0 = vor.u32 1.1754944e-38, %v290_v59  ;;  %vm289_vm3 = vcmp.eq.f32.partialorder %v288_v62, 8.507059e+37 }
  0xca   : > { %v480_v55 = vpop.eup %479 }
  0xcb   : > { %v280_v57 = vmul.f32 %v480_v55, %v278_v52  ;;  %vm285_vm0 = vweird.f32 %v480_v55 }
  0xcc   : > { %vm286_vm2 = vmor %vm284_vm1, %vm285_vm0 }
  0xcd   : > { %v281_v58 = vsub.f32 1.0, %v280_v57 }
  0xcf   : > { %v282_v61 = vmul.f32 %v480_v55, %v281_v58 }
  0xd1   : > { %v283_v63 = vadd.f32 %v480_v55, %v282_v61 }
  0xd3   : > { %v287_v2 = vsel %vm286_vm2, %v480_v55, %v283_v63 }
  0xd4   : > { %v292_v3 = vsel %vm289_vm3, %v291_v0, %v287_v2 }
  0xd5   : > { %v293_v4 = vmul.f32 %v292_v3, %v268_v1 }
  0xd7   : > { %v452_v5 = vclamps-f32 %v293_v4, 1.0 }
  0xd9   : > { %v296_v7 = vadd.f32 1.0, %v452_v5 }
  0xdb   : > { %v297_v8 = vmul.f32 %v296_v7, %v254_v6 }
  0xdd   : > { %330 = vmatmul.f32.vlgmr.msra.gmra.mxu1 %v297_v8 }
 0x15a   : > { %v331_v9 = vpop.f32.mrf.mxu1 }
 0x15b   : > { %350 = vst [vmem:[%s216_s18] sm:$0xff] %v331_v9 }
 0x15c PF: > { %s13_s14 = sadd.s32 1, %s503_s14   ;;  %s669_s12 = smov %s499_s13 }
 0x15d   : > { %p10_p5 = scmp.ge.s32.totalorder %s13_s14, 4   ;;  %s670_s13 = smov %s672_s15 }
 0x15f   :  { %12 = sbr.rel (!%p10_p5) target bundleno = 2 (0x2), region = 80 }

</bundles_post_ra>
